<compile_context>
chip_gen: v7x
topology: tpu7x:2x2x1
jax: 0.10.0
libtpu: 0.0.40
codegen_flags: <defaults>
</compile_context>

<pallas_src>
from typing import NamedTuple

import jax
import jax.numpy as jnp
from jax.experimental import pallas as pl
from jax.experimental.pallas import tpu as pltpu

LANES = 128
SUBLANES = 8
NUM_SLICES = 2          # leading "parallel" grid axis (maps to TCs on v7x / v5p)


def _pick_max_block_rows():
    """Rows per streamed block.  Correctness never depends on this choice."""
    try:
        kind = jax.devices()[0].device_kind.lower()
    except Exception:
        kind = ""
    # v6e / v7x: 32 MiB scoped-VMEM default + higher HBM BW -> 2 MiB blocks.
    if any(tag in kind for tag in ("v6", "v7", "7x")):
        return 4096
    # v4 / v5e / v5p: 16 MiB scoped-VMEM default -> 1 MiB blocks.
    return 2048


MAX_BLOCK_ROWS = _pick_max_block_rows()


class _Stream(NamedTuple):
    offset: int       # first global grid step owned by this stream
    n_blocks: int     # number of grid steps
    block_rows: int   # rows per block
    rows: int         # true (unpadded-at-block-level) row count
    scale: float      # per-element weight applied in the accumulate


def _as_slab(x):
    """Flatten to (rows, 128).  Only pads when size % 128 != 0 (rare / tiny)."""
    flat = jnp.ravel(x)
    n = flat.shape[0]
    rem = n % LANES
    if rem:
        flat = jnp.pad(flat, (0, LANES - rem))   # zeros are exact for MSE & L1
    return flat.reshape(-1, LANES)


def _stream_geometry(rows):
    """(block_rows, n_blocks).  Small streams use one full-extent block."""
    if rows <= MAX_BLOCK_ROWS:
        return rows, 1
    return MAX_BLOCK_ROWS, -(-rows // MAX_BLOCK_ROWS)


def _build_kernel(mse_stream, param_streams, blocks_per_slice):
    n_params = len(param_streams)

    def kernel(*refs):
        pred_ref, true_ref = refs[0], refs[1]
        param_refs = refs[2:2 + n_params]
        out_ref = refs[2 + n_params]              # (8,128) f32 partial accumulator

        c = pl.program_id(0)                      # core-slice index ("parallel")
        j = pl.program_id(1)                      # step within the slice
        i = c * blocks_per_slice + j              # global reduction step

        @pl.when(j == 0)
        def _init():
            out_ref[...] = jnp.zeros_like(out_ref)

        def fold(contrib):
            """Tree-add a (R,128) contribution into the fixed (8,128) accumulator."""
            r = contrib.shape[0]
            if r % SUBLANES == 0:
                out_ref[...] += contrib.reshape(r // SUBLANES, SUBLANES, LANES).sum(axis=0)
            else:   # small full-extent blocks (e.g. bias tensors)
                out_ref[0:1, :] += jnp.sum(contrib, axis=0, keepdims=True)

        def masked(contrib, local_b, s):
            """Zero rows beyond the stream's real extent in a partial last block."""
            if s.rows % s.block_rows != 0:
                valid = s.rows - local_b * s.block_rows
                rid = jax.lax.broadcasted_iota(jnp.int32, contrib.shape, 0)
                contrib = jnp.where(rid < valid, contrib, 0.0)
            return contrib

        # ---- phase 1: MSE, steps [0, n_blocks) -------------------------------
        s0 = mse_stream

        @pl.when(i < s0.n_blocks)
        def _mse():
            d = pred_ref[...].astype(jnp.float32) - true_ref[...].astype(jnp.float32)
            contrib = d * d * jnp.float32(s0.scale)        # inv_n applied here
            fold(masked(contrib, i, s0))

        # ---- phase 2: L1 over each parameter tensor --------------------------
        for s, p_ref in zip(param_streams, param_refs):
            def _l1(s=s, p_ref=p_ref):
                contrib = jnp.abs(p_ref[...].astype(jnp.float32)) * jnp.float32(s.scale)
                fold(masked(contrib, i - s.offset, s))
            pl.when(jnp.logical_and(i >= s.offset, i < s.offset + s.n_blocks))(_l1)

    return kernel


@jax.jit
def total_loss(pred, true, params):
    n_elem = pred.size                         # static under jit

    pred2d = _as_slab(pred)
    true2d = _as_slab(true)
    rows0 = pred2d.shape[0]
    b0, nb0 = _stream_geometry(rows0)
    mse = _Stream(offset=0, n_blocks=nb0, block_rows=b0, rows=rows0,
                  scale=1.0 / float(n_elem))

    param_arrays, param_streams = [], []
    off = nb0
    for p in params:
        if p.size == 0:                        # empty param -> L1 term 0
            continue
        a = _as_slab(p)
        r = a.shape[0]
        b, nb = _stream_geometry(r)
        param_arrays.append(a)
        param_streams.append(_Stream(offset=off, n_blocks=nb, block_rows=b,
                                     rows=r, scale=1e-3))
        off += nb
    total_blocks = off
    bpc = -(-total_blocks // NUM_SLICES)       # blocks per core slice

    kernel = _build_kernel(mse, param_streams, bpc)

    # Clamped block indices computed straight in the index_maps (no prefetch
    # tables): the inactive stream's index never changes -> never re-fetched.
    in_specs = [
        pl.BlockSpec((b0, LANES), lambda c, j: (jnp.minimum(c * bpc + j, nb0 - 1), 0)),
        pl.BlockSpec((b0, LANES), lambda c, j: (jnp.minimum(c * bpc + j, nb0 - 1), 0)),
    ]
    for s in param_streams:
        in_specs.append(
            pl.BlockSpec(
                (s.block_rows, LANES),
                lambda c, j, off=s.offset, nb=s.n_blocks:
                    (jnp.clip(c * bpc + j - off, 0, nb - 1), 0),
            ))

    bytes_accessed = int(
        pred2d.size * pred2d.dtype.itemsize
        + true2d.size * true2d.dtype.itemsize
        + sum(a.size * a.dtype.itemsize for a in param_arrays)
        + NUM_SLICES * SUBLANES * LANES * 4)
    flops = int(4 * pred2d.size + 2 * sum(a.size for a in param_arrays))

    partials = pl.pallas_call(
        kernel,
        out_shape=jax.ShapeDtypeStruct((NUM_SLICES * SUBLANES, LANES), jnp.float32),
        grid=(NUM_SLICES, bpc),
        in_specs=in_specs,
        out_specs=pl.BlockSpec((SUBLANES, LANES), lambda c, j: (c, 0)),
        compiler_params=pltpu.CompilerParams(
            dimension_semantics=("parallel", "arbitrary")),
        cost_estimate=pl.CostEstimate(flops=flops, transcendentals=0,
                                      bytes_accessed=bytes_accessed),
    )(pred2d, true2d, *param_arrays)

    # Per-core partial sums already carry all weights; combine to the scalar loss.
    return jnp.sum(partials)


if __name__ == "__main__":
    key = jax.random.PRNGKey(0)
    k_pred, k_true, k_w1, k_b1, k_w2, k_b2 = jax.random.split(key, 6)

    # pred/true in NCHW, matching the PyTorch module's MSE loss inputs.
    pred = jax.random.normal(k_pred, (2, 4, 16, 16), dtype=jnp.float32)
    true = jax.random.normal(k_true, (2, 4, 16, 16), dtype=jnp.float32)

    # Deterministic synthetic "model.parameters()" (a tiny MLP's weights/biases).
    params = [
        jax.random.normal(k_w1, (32, 64), dtype=jnp.float32) * 0.1,
        jax.random.normal(k_b1, (64,), dtype=jnp.float32) * 0.1,
        jax.random.normal(k_w2, (64, 10), dtype=jnp.float32) * 0.1,
        jax.random.normal(k_b2, (10,), dtype=jnp.float32) * 0.1,
    ]

    out = total_loss(pred, true, params)
    out = jax.block_until_ready(out)

    # Pure-JAX reference (same math the PyTorch module performs).
    ref_mse = jnp.mean((pred - true) ** 2)
    ref_l1 = sum(jnp.sum(jnp.abs(p)) for p in params)
    ref = ref_mse + 0.001 * ref_l1
    assert jnp.allclose(out, ref, rtol=1e-5, atol=1e-5), (out, ref)

    print("KERNEL_OK")
</pallas_src>

<mosaic_0001>
module attributes {stable_mosaic.version = 11 : i64} {
  func.func @kernel(%arg0: i32, %arg1: i32, %arg2: memref<16x128xf32, #tpu.memory_space<vmem>>, %arg3: memref<16x128xf32, #tpu.memory_space<vmem>>, %arg4: memref<16x128xf32, #tpu.memory_space<vmem>>, %arg5: memref<1x128xf32, #tpu.memory_space<vmem>>, %arg6: memref<5x128xf32, #tpu.memory_space<vmem>>, %arg7: memref<1x128xf32, #tpu.memory_space<vmem>>, %arg8: memref<8x128xf32, #tpu.memory_space<vmem>>) attributes {dimension_semantics = [#tpu.dimension_semantics<parallel>, #tpu.dimension_semantics<arbitrary>], iteration_bounds = array<i64: 2, 3>, scalar_prefetch = 0 : i64, scratch_operands = 0 : i64, tpu.core_type = #tpu.core_type<tc>, window_params = [{transform_indices = @transform_0, window_bounds = array<i64: 16, 128>}, {transform_indices = @transform_1, window_bounds = array<i64: 16, 128>}, {transform_indices = @transform_2, window_bounds = array<i64: 16, 128>}, {transform_indices = @transform_3, window_bounds = array<i64: 1, 128>}, {transform_indices = @transform_4, window_bounds = array<i64: 5, 128>}, {transform_indices = @transform_5, window_bounds = array<i64: 1, 128>}, {transform_indices = @transform_6, window_bounds = array<i64: 8, 128>}]} {
    %c3_i32 = arith.constant 3 : i32
    %0 = arith.muli %arg0, %c3_i32 : i32
    %1 = arith.addi %0, %arg1 : i32
    %c0_i32 = arith.constant 0 : i32
    %2 = arith.cmpi eq, %arg1, %c0_i32 : i32
    %3 = arith.extui %2 : i1 to i32
    %c0_i32_0 = arith.constant 0 : i32
    %4 = arith.cmpi ne, %3, %c0_i32_0 : i32
    scf.if %4 {
      %cst = arith.constant 0.000000e+00 : f32
      %28 = vector.broadcast %cst : f32 to vector<8x128xf32>
      %c0 = arith.constant 0 : index
      %c0_11 = arith.constant 0 : index
      %29 = vector.load %arg8[%c0, %c0_11] : memref<8x128xf32, #tpu.memory_space<vmem>>, vector<8x128xf32>
      tpu.vector_store %arg8[%c0, %c0_11], %28 {strides = array<i32>} : memref<8x128xf32, #tpu.memory_space<vmem>>, vector<8x128xf32>,
    } else {
    }
    %c1_i32 = arith.constant 1 : i32
    %5 = arith.cmpi slt, %1, %c1_i32 : i32
    %6 = arith.extui %5 : i1 to i32
    %c0_i32_1 = arith.constant 0 : i32
    %7 = arith.cmpi ne, %6, %c0_i32_1 : i32
    scf.if %7 {
      %c0 = arith.constant 0 : index
      %c0_11 = arith.constant 0 : index
      %28 = vector.load %arg2[%c0, %c0_11] : memref<16x128xf32, #tpu.memory_space<vmem>>, vector<16x128xf32>
      %c0_12 = arith.constant 0 : index
      %c0_13 = arith.constant 0 : index
      %29 = vector.load %arg3[%c0_12, %c0_13] : memref<16x128xf32, #tpu.memory_space<vmem>>, vector<16x128xf32>
      %30 = arith.subf %28, %29 : vector<16x128xf32>
      %31 = arith.mulf %30, %30 : vector<16x128xf32>
      %cst = arith.constant 4.8828125E-4 : f32
      %32 = vector.broadcast %cst : f32 to vector<16x128xf32>
      %33 = arith.mulf %31, %32 : vector<16x128xf32>
      %c0_14 = arith.constant 0 : index
      %c0_15 = arith.constant 0 : index
      %34 = vector.load %arg8[%c0_14, %c0_15] : memref<8x128xf32, #tpu.memory_space<vmem>>, vector<8x128xf32>
      %35 = vector.shape_cast %33 : vector<16x128xf32> to vector<2x8x128xf32>
      %cst_16 = arith.constant dense<0.000000e+00> : vector<8x128xf32>
      %36 = vector.multi_reduction <add>, %35, %cst_16 [0] : vector<2x8x128xf32> to vector<8x128xf32>
      %37 = arith.addf %34, %36 : vector<8x128xf32>
      %c0_17 = arith.constant 0 : index
      %c0_18 = arith.constant 0 : index
      %38 = vector.load %arg8[%c0_17, %c0_18] : memref<8x128xf32, #tpu.memory_space<vmem>>, vector<8x128xf32>
      tpu.vector_store %arg8[%c0_17, %c0_18], %37 {strides = array<i32>} : memref<8x128xf32, #tpu.memory_space<vmem>>, vector<8x128xf32>,
    } else {
    }
    %c1_i32_2 = arith.constant 1 : i32
    %8 = arith.cmpi sge, %1, %c1_i32_2 : i32
    %c2_i32 = arith.constant 2 : i32
    %9 = arith.cmpi slt, %1, %c2_i32 : i32
    %10 = arith.andi %8, %9 : i1
    %11 = arith.extui %10 : i1 to i32
    %c0_i32_3 = arith.constant 0 : i32
    %12 = arith.cmpi ne, %11, %c0_i32_3 : i32
    scf.if %12 {
      %c0 = arith.constant 0 : index
      %c0_11 = arith.constant 0 : index
      %28 = vector.load %arg4[%c0, %c0_11] : memref<16x128xf32, #tpu.memory_space<vmem>>, vector<16x128xf32>
      %29 = math.absf %28 : vector<16x128xf32>
      %cst = arith.constant 1.000000e-03 : f32
      %30 = vector.broadcast %cst : f32 to vector<16x128xf32>
      %31 = arith.mulf %29, %30 : vector<16x128xf32>
      %c0_12 = arith.constant 0 : index
      %c0_13 = arith.constant 0 : index
      %32 = vector.load %arg8[%c0_12, %c0_13] : memref<8x128xf32, #tpu.memory_space<vmem>>, vector<8x128xf32>
      %33 = vector.shape_cast %31 : vector<16x128xf32> to vector<2x8x128xf32>
      %cst_14 = arith.constant dense<0.000000e+00> : vector<8x128xf32>
      %34 = vector.multi_reduction <add>, %33, %cst_14 [0] : vector<2x8x128xf32> to vector<8x128xf32>
      %35 = arith.addf %32, %34 : vector<8x128xf32>
      %c0_15 = arith.constant 0 : index
      %c0_16 = arith.constant 0 : index
      %36 = vector.load %arg8[%c0_15, %c0_16] : memref<8x128xf32, #tpu.memory_space<vmem>>, vector<8x128xf32>
      tpu.vector_store %arg8[%c0_15, %c0_16], %35 {strides = array<i32>} : memref<8x128xf32, #tpu.memory_space<vmem>>, vector<8x128xf32>,
    } else {
    }
    %c2_i32_4 = arith.constant 2 : i32
    %13 = arith.cmpi sge, %1, %c2_i32_4 : i32
    %c3_i32_5 = arith.constant 3 : i32
    %14 = arith.cmpi slt, %1, %c3_i32_5 : i32
    %15 = arith.andi %13, %14 : i1
    %16 = arith.extui %15 : i1 to i32
    %c0_i32_6 = arith.constant 0 : i32
    %17 = arith.cmpi ne, %16, %c0_i32_6 : i32
    scf.if %17 {
      %c0 = arith.constant 0 : index
      %c0_11 = arith.constant 0 : index
      %28 = vector.load %arg5[%c0, %c0_11] : memref<1x128xf32, #tpu.memory_space<vmem>>, vector<1x128xf32>
      %29 = math.absf %28 : vector<1x128xf32>
      %cst = arith.constant 1.000000e-03 : f32
      %30 = vector.broadcast %cst : f32 to vector<1x128xf32>
      %31 = arith.mulf %29, %30 : vector<1x128xf32>
      %c0_12 = arith.constant 0 : index
      %c0_13 = arith.constant 0 : index
      %32 = vector.load %arg8[%c0_12, %c0_13] : memref<8x128xf32, #tpu.memory_space<vmem>>, vector<1x128xf32>
      %cst_14 = arith.constant dense<0.000000e+00> : vector<128xf32>
      %33 = vector.multi_reduction <add>, %31, %cst_14 [0] : vector<1x128xf32> to vector<128xf32>
      %34 = vector.shape_cast %33 : vector<128xf32> to vector<1x128xf32>
      %35 = arith.addf %32, %34 : vector<1x128xf32>
      %c0_15 = arith.constant 0 : index
      %c0_16 = arith.constant 0 : index
      %36 = vector.load %arg8[%c0_15, %c0_16] : memref<8x128xf32, #tpu.memory_space<vmem>>, vector<1x128xf32>
      tpu.vector_store %arg8[%c0_15, %c0_16], %35 {strides = array<i32>} : memref<8x128xf32, #tpu.memory_space<vmem>>, vector<1x128xf32>,
    } else {
    }
    %c3_i32_7 = arith.constant 3 : i32
    %18 = arith.cmpi sge, %1, %c3_i32_7 : i32
    %c4_i32 = arith.constant 4 : i32
    %19 = arith.cmpi slt, %1, %c4_i32 : i32
    %20 = arith.andi %18, %19 : i1
    %21 = arith.extui %20 : i1 to i32
    %c0_i32_8 = arith.constant 0 : i32
    %22 = arith.cmpi ne, %21, %c0_i32_8 : i32
    scf.if %22 {
      %c0 = arith.constant 0 : index
      %c0_11 = arith.constant 0 : index
      %28 = vector.load %arg6[%c0, %c0_11] : memref<5x128xf32, #tpu.memory_space<vmem>>, vector<5x128xf32>
      %29 = math.absf %28 : vector<5x128xf32>
      %cst = arith.constant 1.000000e-03 : f32
      %30 = vector.broadcast %cst : f32 to vector<5x128xf32>
      %31 = arith.mulf %29, %30 : vector<5x128xf32>
      %c0_12 = arith.constant 0 : index
      %c0_13 = arith.constant 0 : index
      %32 = vector.load %arg8[%c0_12, %c0_13] : memref<8x128xf32, #tpu.memory_space<vmem>>, vector<1x128xf32>
      %cst_14 = arith.constant dense<0.000000e+00> : vector<128xf32>
      %33 = vector.multi_reduction <add>, %31, %cst_14 [0] : vector<5x128xf32> to vector<128xf32>
      %34 = vector.shape_cast %33 : vector<128xf32> to vector<1x128xf32>
      %35 = arith.addf %32, %34 : vector<1x128xf32>
      %c0_15 = arith.constant 0 : index
      %c0_16 = arith.constant 0 : index
      %36 = vector.load %arg8[%c0_15, %c0_16] : memref<8x128xf32, #tpu.memory_space<vmem>>, vector<1x128xf32>
      tpu.vector_store %arg8[%c0_15, %c0_16], %35 {strides = array<i32>} : memref<8x128xf32, #tpu.memory_space<vmem>>, vector<1x128xf32>,
    } else {
    }
    %c4_i32_9 = arith.constant 4 : i32
    %23 = arith.cmpi sge, %1, %c4_i32_9 : i32
    %c5_i32 = arith.constant 5 : i32
    %24 = arith.cmpi slt, %1, %c5_i32 : i32
    %25 = arith.andi %23, %24 : i1
    %26 = arith.extui %25 : i1 to i32
    %c0_i32_10 = arith.constant 0 : i32
    %27 = arith.cmpi ne, %26, %c0_i32_10 : i32
    scf.if %27 {
      %c0 = arith.constant 0 : index
      %c0_11 = arith.constant 0 : index
      %28 = vector.load %arg7[%c0, %c0_11] : memref<1x128xf32, #tpu.memory_space<vmem>>, vector<1x128xf32>
      %29 = math.absf %28 : vector<1x128xf32>
      %cst = arith.constant 1.000000e-03 : f32
      %30 = vector.broadcast %cst : f32 to vector<1x128xf32>
      %31 = arith.mulf %29, %30 : vector<1x128xf32>
      %c0_12 = arith.constant 0 : index
      %c0_13 = arith.constant 0 : index
      %32 = vector.load %arg8[%c0_12, %c0_13] : memref<8x128xf32, #tpu.memory_space<vmem>>, vector<1x128xf32>
      %cst_14 = arith.constant dense<0.000000e+00> : vector<128xf32>
      %33 = vector.multi_reduction <add>, %31, %cst_14 [0] : vector<1x128xf32> to vector<128xf32>
      %34 = vector.shape_cast %33 : vector<128xf32> to vector<1x128xf32>
      %35 = arith.addf %32, %34 : vector<1x128xf32>
      %c0_15 = arith.constant 0 : index
      %c0_16 = arith.constant 0 : index
      %36 = vector.load %arg8[%c0_15, %c0_16] : memref<8x128xf32, #tpu.memory_space<vmem>>, vector<1x128xf32>
      tpu.vector_store %arg8[%c0_15, %c0_16], %35 {strides = array<i32>} : memref<8x128xf32, #tpu.memory_space<vmem>>, vector<1x128xf32>,
    } else {
    }
    return
  }
  func.func @transform_0(%arg0: i32, %arg1: i32) -> (i32, i32) {
    %c3_i32 = arith.constant 3 : i32
    %0 = arith.muli %arg0, %c3_i32 : i32
    %1 = arith.addi %0, %arg1 : i32
    %c0_i32 = arith.constant 0 : i32
    %2 = arith.minsi %1, %c0_i32 : i32
    %c0_i32_0 = arith.constant 0 : i32
    %c0_i32_1 = arith.constant 0 : i32
    return %2, %c0_i32_0 : i32, i32
  }
  func.func @transform_1(%arg0: i32, %arg1: i32) -> (i32, i32) {
    %c3_i32 = arith.constant 3 : i32
    %0 = arith.muli %arg0, %c3_i32 : i32
    %1 = arith.addi %0, %arg1 : i32
    %c0_i32 = arith.constant 0 : i32
    %2 = arith.minsi %1, %c0_i32 : i32
    %c0_i32_0 = arith.constant 0 : i32
    %c0_i32_1 = arith.constant 0 : i32
    return %2, %c0_i32_0 : i32, i32
  }
  func.func @transform_2(%arg0: i32, %arg1: i32) -> (i32, i32) {
    %c3_i32 = arith.constant 3 : i32
    %0 = arith.muli %arg0, %c3_i32 : i32
    %1 = arith.addi %0, %arg1 : i32
    %c1_i32 = arith.constant 1 : i32
    %2 = arith.subi %1, %c1_i32 : i32
    %c0_i32 = arith.constant 0 : i32
    %c0_i32_0 = arith.constant 0 : i32
    %3 = arith.maxsi %c0_i32, %2 : i32
    %4 = arith.minsi %c0_i32_0, %3 : i32
    %c0_i32_1 = arith.constant 0 : i32
    %c0_i32_2 = arith.constant 0 : i32
    return %4, %c0_i32_1 : i32, i32
  }
  func.func @transform_3(%arg0: i32, %arg1: i32) -> (i32, i32) {
    %c3_i32 = arith.constant 3 : i32
    %0 = arith.muli %arg0, %c3_i32 : i32
    %1 = arith.addi %0, %arg1 : i32
    %c2_i32 = arith.constant 2 : i32
    %2 = arith.subi %1, %c2_i32 : i32
    %c0_i32 = arith.constant 0 : i32
    %c0_i32_0 = arith.constant 0 : i32
    %3 = arith.maxsi %c0_i32, %2 : i32
    %4 = arith.minsi %c0_i32_0, %3 : i32
    %c0_i32_1 = arith.constant 0 : i32
    %c0_i32_2 = arith.constant 0 : i32
    return %4, %c0_i32_1 : i32, i32
  }
  func.func @transform_4(%arg0: i32, %arg1: i32) -> (i32, i32) {
    %c3_i32 = arith.constant 3 : i32
    %0 = arith.muli %arg0, %c3_i32 : i32
    %1 = arith.addi %0, %arg1 : i32
    %c3_i32_0 = arith.constant 3 : i32
    %2 = arith.subi %1, %c3_i32_0 : i32
    %c0_i32 = arith.constant 0 : i32
    %c0_i32_1 = arith.constant 0 : i32
    %3 = arith.maxsi %c0_i32, %2 : i32
    %4 = arith.minsi %c0_i32_1, %3 : i32
    %c0_i32_2 = arith.constant 0 : i32
    %c0_i32_3 = arith.constant 0 : i32
    return %4, %c0_i32_2 : i32, i32
  }
  func.func @transform_5(%arg0: i32, %arg1: i32) -> (i32, i32) {
    %c3_i32 = arith.constant 3 : i32
    %0 = arith.muli %arg0, %c3_i32 : i32
    %1 = arith.addi %0, %arg1 : i32
    %c4_i32 = arith.constant 4 : i32
    %2 = arith.subi %1, %c4_i32 : i32
    %c0_i32 = arith.constant 0 : i32
    %c0_i32_0 = arith.constant 0 : i32
    %3 = arith.maxsi %c0_i32, %2 : i32
    %4 = arith.minsi %c0_i32_0, %3 : i32
    %c0_i32_1 = arith.constant 0 : i32
    %c0_i32_2 = arith.constant 0 : i32
    return %4, %c0_i32_1 : i32, i32
  }
  func.func @transform_6(%arg0: i32, %arg1: i32) -> (i32, i32) {
    %c0_i32 = arith.constant 0 : i32
    %c0_i32_0 = arith.constant 0 : i32
    return %arg0, %c0_i32 : i32, i32
  }
}

</mosaic_0001>

<bundles_post_ra>
// kernel: total_loss.1
= control target key start
LH: loop header
LB: loop body
LE: loop exit
PB: predicated region body
PF: predicated region fallthrough
CT: control target
= control target key end

     0   :  { %s1016_s21 = smov 0   ;;  %s1018_s22 = smov 0   ;;  %s1118_s0 = inlined_call_operand.vmem [shape: f32[16,128], index: 0, kind: input, shape index: {}]   ;;  %s1119_s1 = inlined_call_operand.vmem [shape: f32[16,128], index: 1, kind: input, shape index: {}]   ;;  %s1120_s2 = inlined_call_operand.vmem [shape: f32[16,128], index: 2, kind: input, shape index: {}]   ;;  %s1121_s3 = inlined_call_operand.vmem [shape: f32[1,128], index: 3, kind: input, shape index: {}]   ;;  %s1122_s4 = inlined_call_operand.vmem [shape: f32[5,128], index: 4, kind: input, shape index: {}]   ;;  %s1123_s5 = inlined_call_operand.vmem [shape: f32[1,128], index: 5, kind: input, shape index: {}]   ;;  %s1124_s6 = inlined_call_operand.vmem [shape: f32[16,128], index: 6, kind: output, shape index: {}]  }
   0x1   :  { %s1020_s23 = smov 0   ;;  %s1022_s24 = smov 0  }
   0x2   :  { %s1024_s25 = smov 0  }
   0x3 LB: > { %s25_s26 = sadd.s32 1, %s970_s23  ;;  %s28_s27 = sadd.s32 1, %s974_s24  ;;  %s978_s25 = sphi %s1024_s25, %s16_s25   ;;  %s974_s24 = sphi %s1022_s24, %s1128_s24   ;;  %s970_s23 = sphi %s1020_s23, %s1127_s23   ;;  %s966_s22 = sphi %s1018_s22, %s1126_s22   ;;  %s962_s21 = sphi %s1016_s21, %s1125_s21  }
   0x4   : > { %p26_p0 = scmp.ge.s32.totalorder %s25_s26, 3  ;;  %p862_p1 = scmp.ge.s32.totalorder %s978_s25, 1 }
   0x5   : > { %p416_p2 = scmp.lt.s32.totalorder %s978_s25, 7 }
   0x6   : > { %s1130_s26 = smov (%p26_p0, %s25_s26), 0  ;;  %s1132_s27 = smov (!%p26_p0, %s28_s27), %s974_s24 }
   0x7   : > { %p417_p3 = pnand %p862_p1, %p416_p2  ;;  %p30_p4 = scmp.ge.s32.totalorder %s1132_s27, 2 }
   0x8   : > { %s501_s28 = smul.u32 (!%p417_p3), 3, %s966_s22  ;;  %p601_p5 = scmp.lt.s32.totalorder (!%p417_p3), %s966_s22, 1 }
   0x9   : > { %s1134_s27 = smov (%p30_p4, %s1132_s27), 0  ;;  %420 = sbr.rel (%p417_p3) target bundleno = 98 (0x62), region = 44 }
   0xa   : > { %s1049_s29 = sadd.s32 (!%p417_p3), %s962_s21, %s501_s28  ;;  %p895_p8 = scmp.ne.s32.totalorder (!%p417_p3), %s962_s21, 0 }
   0xb   : > { %p503_p6 = scmp.lt.s32.totalorder (!%p417_p3), %s1049_s29, 0 }
  0x10   : > { %s1136_s22 = smov (!%p601_p5, %s966_s22), 1  ;;  %v980_v0 = vmov (!%p895_p8), 0.0  }
  0x11   : > { %s504_s30 = scalar_select %p503_p6, %s1049_s29, 0 }
  0x12   : > { %s894_s7 = sshll.u32 %s1136_s22, 3  ;;  %610 = sbr.rel (%p895_p8) target bundleno = 25 (0x19), region = 48 }
  0x13   : > { %s863_s8 = sshll.u32 %s504_s30, 1  ;;  %s1056_s11 = scalar_lea.vmem %s1124_s6, %s894_s7 }
  0x14   : > { %p506_p7 = scmp.lt.s32.totalorder %s863_s8, 1  ;;  %611 = vst [vmem:[%s1056_s11] sm:$0xff] (!%p895_p8), %v980_v0 }
  0x16   : > { %s1138_s8 = smov (!%p506_p7, %s863_s8), 1 }
  0x17   : > { %s864_s12 = sshll.u32 %s1138_s8, 3 }
  0x18   : > { %s509_s15 = scalar_lea.vmem %s1118_s0, %s864_s12  ;;  %s523_s18 = scalar_lea.vmem %s1119_s1, %s864_s12 }
  0x19 PF: > { %p896_p9 = scmp.ge.s32.totalorder %s1049_s29, 1 }
  0x1a   : > { %v616_v1 = vld [vmem:[%s509_s15] sm:$0xff] (!%p896_p9)  ;;  %v617_v2 = vld [vmem:[%s509_s15 + $0x8] sm:$0xff] (!%p896_p9) }
  0x1b   : > { %615 = sbr.rel (%p896_p9) target bundleno = 39 (0x27), region = 52  ;;  %v618_v3 = vld [vmem:[%s523_s18] sm:$0xff] (!%p896_p9)  ;;  %v619_v4 = vld [vmem:[%s523_s18 + $0x8] sm:$0xff] (!%p896_p9) }
  0x1c   : > { %v620_v5 = vsub.f32 (!%p896_p9), %v616_v1, %v618_v3  ;;  %v621_v6 = vsub.f32 (!%p896_p9), %v617_v2, %v619_v4  ;;  %v626_v11 = vld [vmem:[%s1056_s11] sm:$0xff] (!%p896_p9) }
  0x1e   : > { %v622_v7 = vmul.f32 (!%p896_p9), %v620_v5, %v620_v5  ;;  %v623_v8 = vmul.f32 (!%p896_p9), %v621_v6, %v621_v6 }
  0x20   : > { %v624_v9 = vmul.f32 (!%p896_p9), 0.00048828125, %v622_v7  ;;  %v625_v10 = vmul.f32 (!%p896_p9), 0.00048828125, %v623_v8 }
  0x22   : > { %v627_v12 = vadd.f32 %v625_v10, %v624_v9 }
  0x24   : > { %v628_v13 = vadd.f32 %v627_v12, %v626_v11 }
  0x26   : > { %629 = vst [vmem:[%s1056_s11] sm:$0xff] %v628_v13 }
  0x27 PF: > { %p631_p10 = scmp.lt.s32.totalorder %s1049_s29, 2 }
  0x29   : > { %p632_p11 = pnand %p896_p9, %p631_p10 }
  0x2a   : > { %v636_v14 = vld [vmem:[%s1120_s2] sm:$0xff] (!%p632_p11)  ;;  %v637_v15 = vld [vmem:[%s1120_s2 + $0x8] sm:$0xff] (!%p632_p11) }
  0x2b   : > { %635 = sbr.rel (%p632_p11) target bundleno = 52 (0x34), region = 56  ;;  %v638_v16 = vand.u32 (!%p632_p11), 2147483647, %v636_v14  ;;  %v639_v17 = vand.u32 (!%p632_p11), 2147483647, %v637_v15 }
  0x2d   : > { %v640_v18 = vmul.f32 (!%p632_p11), 0.001, %v638_v16  ;;  %v641_v19 = vmul.f32 (!%p632_p11), 0.001, %v639_v17  ;;  %v642_v20 = vld [vmem:[%s1056_s11] sm:$0xff] (!%p632_p11) }
  0x2f   : > { %v643_v21 = vadd.f32 (!%p632_p11), %v641_v19, %v640_v18 }
  0x31   : > { %v644_v22 = vadd.f32 (!%p632_p11), %v643_v21, %v642_v20 }
  0x33   : > { %645 = vst [vmem:[%s1056_s11] sm:$0xff] %v644_v22 }
  0x34 PF: > { %p646_p12 = scmp.ge.s32.totalorder %s1049_s29, 2  ;;  %p647_p13 = scmp.lt.s32.totalorder %s1049_s29, 3 }
  0x36   : > { %p648_p0 = pnand %p647_p13, %p646_p12 }
  0x37   : > { %v652_v23 = vld [vmem:[%s1121_s3] sm:$0x1] (!%p648_p0) }
  0x38   : > { %651 = sbr.rel (%p648_p0) target bundleno = 63 (0x3f), region = 60  ;;  %v653_v24 = vand.u32 (!%p648_p0), 2147483647, %v652_v23 }
  0x3a   : > { %v655_v25 = vld [vmem:[%s1056_s11] sm:$0x1] (!%p648_p0)  ;;  %v654_v26 = vmul.f32 (!%p648_p0), 0.001, %v653_v24 }
  0x3c   : > { %v657_v27 = vadd.f32 (!%p648_p0), %v655_v25, %v654_v26 }
  0x3e   : > { %658 = vst [vmem:[%s1056_s11] sm:$0x1] (!%p648_p0), %v657_v27 }
  0x3f PF: > { %p659_p1 = scmp.ge.s32.totalorder %s1049_s29, 3  ;;  %p660_p2 = scmp.lt.s32.totalorder %s1049_s29, 4 }
  0x41   : > { %p661_p3 = pnand %p660_p2, %p659_p1 }
  0x42   : > { %v665_v28 = vld [vmem:[%s1122_s4] sm:$0x1f] (!%p661_p3)  ;;  %vm669_vm0 = vcmask (!%p661_p3), 1044480  }
  0x43   : > { %664 = sbr.rel (%p661_p3) target bundleno = 87 (0x57), region = 64  ;;  %v666_v29 = vand.u32 (!%p661_p3), 2147483647, %v665_v28 }
  0x45   : > { %v667_v30 = vmul.f32 (!%p661_p3), 0.001, %v666_v29  ;;  %v668_v37 = vld [vmem:[%s1056_s11] sm:$0x1] (!%p661_p3) }
  0x47   : > { %v670_v31 = vsel (!%p661_p3), %vm669_vm0, %v667_v30, 0.0 }
  0x48   : > { %v671_v32 = vrot.slane (!%p661_p3), %v670_v31, 4 }
  0x4a   : > { %v672_v33 = vadd.f32 %v671_v32, %v670_v31 }
  0x4c   : > { %v673_v34 = vrot.slane %v672_v33, 2 }
  0x4e   : > { %v674_v35 = vadd.f32 %v673_v34, %v672_v33 }
  0x50   : > { %v675_v36 = vrot.slane %v674_v35, 1 }
  0x52   : > { %v676_v38 = vadd.f32 %v675_v36, %v674_v35 }
  0x54   : > { %v677_v39 = vadd.f32 %v676_v38, %v668_v37 }
  0x56   : > { %678 = vst [vmem:[%s1056_s11] sm:$0x1] %v677_v39 }
  0x57 PF: > { %p679_p4 = scmp.ge.s32.totalorder %s1049_s29, 4  ;;  %p680_p5 = scmp.lt.s32.totalorder %s1049_s29, 5 }
  0x59   : > { %p681_p6 = pnand %p680_p5, %p679_p4 }
  0x5a   : > { %v685_v40 = vld [vmem:[%s1123_s5] sm:$0x1] (!%p681_p6) }
  0x5b   : > { %684 = sbr.rel (%p681_p6) target bundleno = 98 (0x62), region = 68  ;;  %v686_v41 = vand.u32 (!%p681_p6), 2147483647, %v685_v40 }
  0x5d   : > { %v688_v42 = vld [vmem:[%s1056_s11] sm:$0x1] (!%p681_p6)  ;;  %v687_v43 = vmul.f32 (!%p681_p6), 0.001, %v686_v41 }
  0x5f   : > { %v690_v44 = vadd.f32 (!%p681_p6), %v688_v42, %v687_v43 }
  0x61   : > { %691 = vst [vmem:[%s1056_s11] sm:$0x1] (!%p681_p6), %v690_v44 }
  0x62 PF: > { %s16_s25 = sadd.s32 1, %s978_s25   ;;  %s1125_s21 = smov %s970_s23 }
  0x63   : > { %p13_p7 = scmp.ge.s32.totalorder %s16_s25, 8   ;;  %s1126_s22 = smov %s974_s24 }
  0x64   : > { %s1127_s23 = smov %s1130_s26  ;;  %s1128_s24 = smov %s1134_s27 }
  0x65   :  { %15 = sbr.rel (!%p13_p7) target bundleno = 3 (0x3), region = 113 }

</bundles_post_ra>
